<compile_context>
chip_gen: v7x
topology: tpu7x:2x2x1
jax: 0.10.0
libtpu: 0.0.40
codegen_flags: <defaults>
</compile_context>

<pallas_src>
import functools

import jax
import jax.numpy as jnp
from jax import lax
from jax.experimental import pallas as pl
from jax.experimental.pallas import tpu as pltpu


def _combined_loss_kernel(pred_ref, tgt_ref, out_ref,
                          inter_acc, union_acc, focal_acc,
                          *, gamma, focal_alpha, pos_weight,
                          n_valid, tile_n, tiles_per_chunk, needs_mask):
    c = pl.program_id(0)            # parallel chunk (TensorCore shard)
    i = pl.program_id(1)            # reduction step within the chunk
    n_inner = pl.num_programs(1)

    @pl.when(i == 0)
    def _init():
        inter_acc[...] = jnp.zeros_like(inter_acc)
        union_acc[...] = jnp.zeros_like(union_acc)
        focal_acc[...] = jnp.zeros_like(focal_acc)

    x = pred_ref[...].astype(jnp.float32)    # (B, TILE_N) logits
    t = tgt_ref[...].astype(jnp.float32)     # (B, TILE_N) targets in [0, 1]

    if needs_mask:
        # Logical global column of each lane; zero out padded / duplicated lanes.
        base = (c * tiles_per_chunk + i) * tile_n
        col = lax.broadcasted_iota(jnp.int32, x.shape, 1)
        valid = (base + col) < n_valid
        x = jnp.where(valid, x, 0.0)
        t = jnp.where(valid, t, 0.0)

    # Shared transcendentals: one exp + one log1p per element.
    e = jnp.exp(-jnp.abs(x))
    inv_1pe = 1.0 / (1.0 + e)
    p = jnp.where(x >= 0.0, inv_1pe, e * inv_1pe)          # sigmoid(x)
    softplus_neg = jnp.log1p(e) + jnp.maximum(-x, 0.0)     # softplus(-x)

    # ---------------- Dice partials ----------------
    w = t * pos_weight + 1.0                               # weight_map
    inter_c = p * t * w
    union_c = (p + t) * w                                  # fused union sum

    # ---------------- Focal partials ----------------
    # Stable BCE-with-logits with pos_weight:
    #   bce = (1 - t) * x + (1 + (pw - 1) * t) * softplus(-x)
    bce = (1.0 - t) * x + (1.0 + (pos_weight - 1.0) * t) * softplus_neg
    one_minus_pt = p + t - 2.0 * p * t                     # 1 - p_t
    if gamma == 2.0:                                       # default fast path
        focal_term = one_minus_pt * one_minus_pt
    else:
        focal_term = one_minus_pt ** gamma
    alpha_t = (1.0 - focal_alpha) + t * (2.0 * focal_alpha - 1.0)
    focal_c = alpha_t * focal_term * bce

    if needs_mask:
        zero = jnp.zeros_like(focal_c)
        inter_c = jnp.where(valid, inter_c, zero)
        union_c = jnp.where(valid, union_c, zero)
        focal_c = jnp.where(valid, focal_c, zero)

    inter_acc[...] += jnp.sum(inter_c, axis=1, keepdims=True)
    union_acc[...] += jnp.sum(union_c, axis=1, keepdims=True)
    focal_acc[...] += jnp.sum(focal_c, axis=1, keepdims=True)

    @pl.when(i == n_inner - 1)
    def _finalize():
        B = inter_acc.shape[0]
        lane = lax.broadcasted_iota(jnp.int32, (B, 128), 1)
        ia = jnp.broadcast_to(inter_acc[...], (B, 128))
        ua = jnp.broadcast_to(union_acc[...], (B, 128))
        fa = jnp.broadcast_to(focal_acc[...], (B, 128))
        packed = jnp.where(lane == 0, ia,
                 jnp.where(lane == 1, ua,
                 jnp.where(lane == 2, fa, 0.0)))
        out_ref[0] = packed                                # one lane-dense write


def combined_loss(pred, target, *, alpha=0.5, gamma=2.0, focal_alpha=0.75,
                  pos_weight=5.0, tile_n=None, num_chunks=2):
    """Returns (combined, dice, focal) scalars, matching CombinedLoss.forward."""
    eps = 1e-6
    B = pred.shape[0]
    pred2 = pred.reshape(B, -1)          # native dtype: no wrapper-side cast pass
    tgt2 = target.reshape(B, -1)
    N = pred2.shape[1]

    # ---- tile sizing on the lane axis (budgeted for the smallest VMEM, v7x) ----
    if tile_n is None:
        itemsize = pred2.dtype.itemsize + tgt2.dtype.itemsize
        budget = 8 * 1024 * 1024                       # all pipelined input bufs
        tile_n = budget // (2 * B * itemsize)          # 2 = double buffering
        tile_n = min(tile_n, 32768)
    tile_n = min(tile_n, ((N + 127) // 128) * 128)
    tile_n = max(128, (tile_n // 128) * 128)

    num_tiles = pl.cdiv(N, tile_n)
    nc = max(1, min(num_chunks, num_tiles))            # parallel chunks (megacore)
    tiles_per_chunk = pl.cdiv(num_tiles, nc)
    needs_mask = (N % tile_n != 0) or (nc * tiles_per_chunk != num_tiles)
    last_tile = num_tiles - 1

    kernel = functools.partial(
        _combined_loss_kernel,
        gamma=float(gamma), focal_alpha=float(focal_alpha),
        pos_weight=float(pos_weight), n_valid=N, tile_n=tile_n,
        tiles_per_chunk=tiles_per_chunk, needs_mask=needs_mask)

    def in_map(c, i):
        # Clamp so padded trailing logical tiles never issue an OOB DMA;
        # the in-kernel mask zeroes their contribution.
        return (0, jnp.minimum(c * tiles_per_chunk + i, last_tile))

    partials = pl.pallas_call(
        kernel,
        out_shape=jax.ShapeDtypeStruct((nc, B, 128), jnp.float32),
        grid=(nc, tiles_per_chunk),
        in_specs=[
            pl.BlockSpec((B, tile_n), in_map),
            pl.BlockSpec((B, tile_n), in_map),
        ],
        out_specs=pl.BlockSpec((1, B, 128), lambda c, i: (c, 0, 0)),
        scratch_shapes=[pltpu.VMEM((B, 1), jnp.float32)] * 3,
        compiler_params=pltpu.CompilerParams(
            dimension_semantics=("parallel", "arbitrary"),
            vmem_limit_bytes=32 * 1024 * 1024),
    )(pred2, tgt2)

    # Tiny final combine (a few elements) in plain JAX.
    inter = jnp.sum(partials[:, :, 0], axis=0)         # (B,)
    union = jnp.sum(partials[:, :, 1], axis=0)         # (B,)
    focal_sum = jnp.sum(partials[:, :, 2])
    dice_coeff = (2.0 * inter + eps) / (union + eps)
    dice = 1.0 - jnp.mean(dice_coeff)
    focal = focal_sum / (B * N)                        # true global mean
    combined = alpha * dice + (1.0 - alpha) * focal
    return combined, dice, focal


def _reference(pred, target, alpha=0.5, gamma=2.0, focal_alpha=0.75, pos_weight=5.0):
    """Pure-JAX reference mirroring the PyTorch module exactly."""
    eps = 1e-6
    B = pred.shape[0]
    x = pred.reshape(B, -1).astype(jnp.float32)
    t = target.reshape(B, -1).astype(jnp.float32)
    p = jax.nn.sigmoid(x)
    w = t * pos_weight + 1.0
    inter = jnp.sum(p * t * w, axis=1)
    union = jnp.sum(p * w, axis=1) + jnp.sum(t * w, axis=1)
    dice = 1.0 - jnp.mean((2.0 * inter + eps) / (union + eps))
    sp = jnp.log1p(jnp.exp(-jnp.abs(x))) + jnp.maximum(-x, 0.0)
    bce = (1.0 - t) * x + (1.0 + (pos_weight - 1.0) * t) * sp
    p_t = t * p + (1.0 - t) * (1.0 - p)
    focal = jnp.mean((t * focal_alpha + (1.0 - t) * (1.0 - focal_alpha))
                     * (1.0 - p_t) ** gamma * bce)
    return alpha * dice + (1.0 - alpha) * focal, dice, focal


def _check(pred, target, **kw):
    got = combined_loss(pred, target, **kw)
    jax.block_until_ready(got)
    want = _reference(pred, target)
    for g, w in zip(got, want):
        assert jnp.allclose(g, w, atol=1e-4, rtol=1e-4), (g, w)


if __name__ == "__main__":
    key = jax.random.PRNGKey(0)
    k1, k2, k3, k4, k5, k6 = jax.random.split(key, 6)

    # Case 1: single tile, no masking (NCHW, batch=2, channels=1, spatial=16x16).
    pred = jax.random.normal(k1, (2, 1, 16, 16), dtype=jnp.float32) * 2.0
    target = (jax.random.uniform(k2, (2, 1, 16, 16)) > 0.7).astype(jnp.float32)
    _check(pred, target)

    # Case 2: bf16 inputs (half the HBM traffic), multi-tile, 2 parallel chunks.
    pred_b = (jax.random.normal(k3, (2, 1, 32, 32), dtype=jnp.float32) * 2.0
              ).astype(jnp.bfloat16)
    target_b = (jax.random.uniform(k4, (2, 1, 32, 32)) > 0.7).astype(jnp.bfloat16)
    _check(pred_b, target_b, tile_n=256)

    # Case 3: ragged N (partial last tile + clamped/masked duplicate tile).
    pred_r = jax.random.normal(k5, (2, 1, 26, 26), dtype=jnp.float32) * 2.0
    target_r = (jax.random.uniform(k6, (2, 1, 26, 26)) > 0.7).astype(jnp.float32)
    _check(pred_r, target_r, tile_n=256)

    print("KERNEL_OK")
</pallas_src>

<mosaic_0001>
module attributes {stable_mosaic.version = 11 : i64} {
  func.func @_combined_loss_kernel(%arg0: i32, %arg1: i32, %arg2: memref<2x256xf32, #tpu.memory_space<vmem>>, %arg3: memref<2x256xf32, #tpu.memory_space<vmem>>, %arg4: memref<1x2x128xf32, #tpu.memory_space<vmem>>, %arg5: memref<2x1xf32, #tpu.memory_space<vmem>>, %arg6: memref<2x1xf32, #tpu.memory_space<vmem>>, %arg7: memref<2x1xf32, #tpu.memory_space<vmem>>) attributes {dimension_semantics = [#tpu.dimension_semantics<parallel>, #tpu.dimension_semantics<arbitrary>], iteration_bounds = array<i64: 1, 1>, scalar_prefetch = 0 : i64, scratch_operands = 3 : i64, tpu.core_type = #tpu.core_type<tc>, window_params = [{transform_indices = @transform_0, window_bounds = array<i64: 2, 256>}, {transform_indices = @transform_1, window_bounds = array<i64: 2, 256>}, {transform_indices = @transform_2, window_bounds = array<i64: 1, 2, 128>}]} {
    %c0_i32 = arith.constant 0 : i32
    %0 = arith.cmpi eq, %arg1, %c0_i32 : i32
    %1 = arith.extui %0 : i1 to i32
    %c0_i32_0 = arith.constant 0 : i32
    %2 = arith.cmpi ne, %1, %c0_i32_0 : i32
    scf.if %2 {
      %cst_34 = arith.constant 0.000000e+00 : f32
      %70 = vector.broadcast %cst_34 : f32 to vector<2x1xf32>
      %c0_35 = arith.constant 0 : index
      %c0_36 = arith.constant 0 : index
      %71 = vector.load %arg5[%c0_35, %c0_36] : memref<2x1xf32, #tpu.memory_space<vmem>>, vector<2x1xf32>
      tpu.vector_store %arg5[%c0_35, %c0_36], %70 {strides = array<i32>} : memref<2x1xf32, #tpu.memory_space<vmem>>, vector<2x1xf32>,
      %cst_37 = arith.constant 0.000000e+00 : f32
      %72 = vector.broadcast %cst_37 : f32 to vector<2x1xf32>
      %c0_38 = arith.constant 0 : index
      %c0_39 = arith.constant 0 : index
      %73 = vector.load %arg6[%c0_38, %c0_39] : memref<2x1xf32, #tpu.memory_space<vmem>>, vector<2x1xf32>
      tpu.vector_store %arg6[%c0_38, %c0_39], %72 {strides = array<i32>} : memref<2x1xf32, #tpu.memory_space<vmem>>, vector<2x1xf32>,
      %cst_40 = arith.constant 0.000000e+00 : f32
      %74 = vector.broadcast %cst_40 : f32 to vector<2x1xf32>
      %c0_41 = arith.constant 0 : index
      %c0_42 = arith.constant 0 : index
      %75 = vector.load %arg7[%c0_41, %c0_42] : memref<2x1xf32, #tpu.memory_space<vmem>>, vector<2x1xf32>
      tpu.vector_store %arg7[%c0_41, %c0_42], %74 {strides = array<i32>} : memref<2x1xf32, #tpu.memory_space<vmem>>, vector<2x1xf32>,
    } else {
    }
    %c0 = arith.constant 0 : index
    %c0_1 = arith.constant 0 : index
    %3 = vector.load %arg2[%c0, %c0_1] : memref<2x256xf32, #tpu.memory_space<vmem>>, vector<2x256xf32>
    %c0_2 = arith.constant 0 : index
    %c0_3 = arith.constant 0 : index
    %4 = vector.load %arg3[%c0_2, %c0_3] : memref<2x256xf32, #tpu.memory_space<vmem>>, vector<2x256xf32>
    %5 = math.absf %3 : vector<2x256xf32>
    %cst = arith.constant 0.000000e+00 : f32
    %6 = vector.broadcast %cst : f32 to vector<2x256xf32>
    %7 = arith.subf %6, %5 : vector<2x256xf32>
    %8 = math.exp %7 : vector<2x256xf32>
    %cst_4 = arith.constant 1.000000e+00 : f32
    %9 = vector.broadcast %cst_4 : f32 to vector<2x256xf32>
    %10 = arith.addf %9, %8 : vector<2x256xf32>
    %cst_5 = arith.constant 1.000000e+00 : f32
    %11 = vector.broadcast %cst_5 : f32 to vector<2x256xf32>
    %12 = arith.divf %11, %10 : vector<2x256xf32>
    %cst_6 = arith.constant 0.000000e+00 : f32
    %13 = vector.broadcast %cst_6 : f32 to vector<2x256xf32>
    %14 = arith.cmpf oge, %3, %13 : vector<2x256xf32>
    %15 = arith.mulf %8, %12 : vector<2x256xf32>
    %16 = arith.select %14, %12, %15 : vector<2x256xi1>, vector<2x256xf32>
    %17 = math.log1p %8 : vector<2x256xf32>
    %cst_7 = arith.constant 0.000000e+00 : f32
    %18 = vector.broadcast %cst_7 : f32 to vector<2x256xf32>
    %19 = arith.subf %18, %3 : vector<2x256xf32>
    %cst_8 = arith.constant 0.000000e+00 : f32
    %20 = vector.broadcast %cst_8 : f32 to vector<2x256xf32>
    %21 = arith.maximumf %19, %20 : vector<2x256xf32>
    %22 = arith.addf %17, %21 : vector<2x256xf32>
    %cst_9 = arith.constant 5.000000e+00 : f32
    %23 = vector.broadcast %cst_9 : f32 to vector<2x256xf32>
    %24 = arith.mulf %4, %23 : vector<2x256xf32>
    %cst_10 = arith.constant 1.000000e+00 : f32
    %25 = vector.broadcast %cst_10 : f32 to vector<2x256xf32>
    %26 = arith.addf %24, %25 : vector<2x256xf32>
    %27 = arith.mulf %16, %4 : vector<2x256xf32>
    %28 = arith.mulf %27, %26 : vector<2x256xf32>
    %29 = arith.addf %16, %4 : vector<2x256xf32>
    %30 = arith.mulf %29, %26 : vector<2x256xf32>
    %cst_11 = arith.constant 1.000000e+00 : f32
    %31 = vector.broadcast %cst_11 : f32 to vector<2x256xf32>
    %32 = arith.subf %31, %4 : vector<2x256xf32>
    %33 = arith.mulf %32, %3 : vector<2x256xf32>
    %cst_12 = arith.constant 4.000000e+00 : f32
    %34 = vector.broadcast %cst_12 : f32 to vector<2x256xf32>
    %35 = arith.mulf %34, %4 : vector<2x256xf32>
    %cst_13 = arith.constant 1.000000e+00 : f32
    %36 = vector.broadcast %cst_13 : f32 to vector<2x256xf32>
    %37 = arith.addf %36, %35 : vector<2x256xf32>
    %38 = arith.mulf %37, %22 : vector<2x256xf32>
    %39 = arith.addf %33, %38 : vector<2x256xf32>
    %40 = arith.addf %16, %4 : vector<2x256xf32>
    %cst_14 = arith.constant 2.000000e+00 : f32
    %41 = vector.broadcast %cst_14 : f32 to vector<2x256xf32>
    %42 = arith.mulf %41, %16 : vector<2x256xf32>
    %43 = arith.mulf %42, %4 : vector<2x256xf32>
    %44 = arith.subf %40, %43 : vector<2x256xf32>
    %45 = arith.mulf %44, %44 : vector<2x256xf32>
    %cst_15 = arith.constant 5.000000e-01 : f32
    %46 = vector.broadcast %cst_15 : f32 to vector<2x256xf32>
    %47 = arith.mulf %4, %46 : vector<2x256xf32>
    %cst_16 = arith.constant 2.500000e-01 : f32
    %48 = vector.broadcast %cst_16 : f32 to vector<2x256xf32>
    %49 = arith.addf %48, %47 : vector<2x256xf32>
    %50 = arith.mulf %49, %45 : vector<2x256xf32>
    %51 = arith.mulf %50, %39 : vector<2x256xf32>
    %c0_17 = arith.constant 0 : index
    %c0_18 = arith.constant 0 : index
    %52 = vector.load %arg5[%c0_17, %c0_18] : memref<2x1xf32, #tpu.memory_space<vmem>>, vector<2x1xf32>
    %cst_19 = arith.constant dense<0.000000e+00> : vector<2xf32>
    %53 = vector.multi_reduction <add>, %28, %cst_19 [1] : vector<2x256xf32> to vector<2xf32>
    %54 = vector.shape_cast %53 : vector<2xf32> to vector<2x1xf32>
    %55 = arith.addf %52, %54 : vector<2x1xf32>
    %c0_20 = arith.constant 0 : index
    %c0_21 = arith.constant 0 : index
    %56 = vector.load %arg5[%c0_20, %c0_21] : memref<2x1xf32, #tpu.memory_space<vmem>>, vector<2x1xf32>
    tpu.vector_store %arg5[%c0_20, %c0_21], %55 {strides = array<i32>} : memref<2x1xf32, #tpu.memory_space<vmem>>, vector<2x1xf32>,
    %c0_22 = arith.constant 0 : index
    %c0_23 = arith.constant 0 : index
    %57 = vector.load %arg6[%c0_22, %c0_23] : memref<2x1xf32, #tpu.memory_space<vmem>>, vector<2x1xf32>
    %cst_24 = arith.constant dense<0.000000e+00> : vector<2xf32>
    %58 = vector.multi_reduction <add>, %30, %cst_24 [1] : vector<2x256xf32> to vector<2xf32>
    %59 = vector.shape_cast %58 : vector<2xf32> to vector<2x1xf32>
    %60 = arith.addf %57, %59 : vector<2x1xf32>
    %c0_25 = arith.constant 0 : index
    %c0_26 = arith.constant 0 : index
    %61 = vector.load %arg6[%c0_25, %c0_26] : memref<2x1xf32, #tpu.memory_space<vmem>>, vector<2x1xf32>
    tpu.vector_store %arg6[%c0_25, %c0_26], %60 {strides = array<i32>} : memref<2x1xf32, #tpu.memory_space<vmem>>, vector<2x1xf32>,
    %c0_27 = arith.constant 0 : index
    %c0_28 = arith.constant 0 : index
    %62 = vector.load %arg7[%c0_27, %c0_28] : memref<2x1xf32, #tpu.memory_space<vmem>>, vector<2x1xf32>
    %cst_29 = arith.constant dense<0.000000e+00> : vector<2xf32>
    %63 = vector.multi_reduction <add>, %51, %cst_29 [1] : vector<2x256xf32> to vector<2xf32>
    %64 = vector.shape_cast %63 : vector<2xf32> to vector<2x1xf32>
    %65 = arith.addf %62, %64 : vector<2x1xf32>
    %c0_30 = arith.constant 0 : index
    %c0_31 = arith.constant 0 : index
    %66 = vector.load %arg7[%c0_30, %c0_31] : memref<2x1xf32, #tpu.memory_space<vmem>>, vector<2x1xf32>
    tpu.vector_store %arg7[%c0_30, %c0_31], %65 {strides = array<i32>} : memref<2x1xf32, #tpu.memory_space<vmem>>, vector<2x1xf32>,
    %c0_i32_32 = arith.constant 0 : i32
    %67 = arith.cmpi eq, %arg1, %c0_i32_32 : i32
    %68 = arith.extui %67 : i1 to i32
    %c0_i32_33 = arith.constant 0 : i32
    %69 = arith.cmpi ne, %68, %c0_i32_33 : i32
    scf.if %69 {
      %70 = tpu.iota {dimensions = array<i32: 1>} : vector<2x128xi32>
      %c0_34 = arith.constant 0 : index
      %c0_35 = arith.constant 0 : index
      %71 = vector.load %arg5[%c0_34, %c0_35] : memref<2x1xf32, #tpu.memory_space<vmem>>, vector<2x1xf32>
      %72 = vector.shape_cast %71 : vector<2x1xf32> to vector<2x1xf32>
      %73 = vector.broadcast %72 : vector<2x1xf32> to vector<2x128xf32>
      %c0_36 = arith.constant 0 : index
      %c0_37 = arith.constant 0 : index
      %74 = vector.load %arg6[%c0_36, %c0_37] : memref<2x1xf32, #tpu.memory_space<vmem>>, vector<2x1xf32>
      %75 = vector.shape_cast %74 : vector<2x1xf32> to vector<2x1xf32>
      %76 = vector.broadcast %75 : vector<2x1xf32> to vector<2x128xf32>
      %c0_38 = arith.constant 0 : index
      %c0_39 = arith.constant 0 : index
      %77 = vector.load %arg7[%c0_38, %c0_39] : memref<2x1xf32, #tpu.memory_space<vmem>>, vector<2x1xf32>
      %78 = vector.shape_cast %77 : vector<2x1xf32> to vector<2x1xf32>
      %79 = vector.broadcast %78 : vector<2x1xf32> to vector<2x128xf32>
      %c0_i32_40 = arith.constant 0 : i32
      %80 = vector.broadcast %c0_i32_40 : i32 to vector<2x128xi32>
      %81 = arith.cmpi eq, %70, %80 : vector<2x128xi32>
      %c1_i32 = arith.constant 1 : i32
      %82 = vector.broadcast %c1_i32 : i32 to vector<2x128xi32>
      %83 = arith.cmpi eq, %70, %82 : vector<2x128xi32>
      %c2_i32 = arith.constant 2 : i32
      %84 = vector.broadcast %c2_i32 : i32 to vector<2x128xi32>
      %85 = arith.cmpi eq, %70, %84 : vector<2x128xi32>
      %cst_41 = arith.constant 0.000000e+00 : f32
      %86 = vector.broadcast %cst_41 : f32 to vector<2x128xf32>
      %87 = arith.select %85, %79, %86 : vector<2x128xi1>, vector<2x128xf32>
      %88 = arith.select %83, %76, %87 : vector<2x128xi1>, vector<2x128xf32>
      %89 = arith.select %81, %73, %88 : vector<2x128xi1>, vector<2x128xf32>
      %c0_42 = arith.constant 0 : index
      %c0_43 = arith.constant 0 : index
      %c0_44 = arith.constant 0 : index
      %90 = vector.load %arg4[%c0_42, %c0_43, %c0_44] : memref<1x2x128xf32, #tpu.memory_space<vmem>>, vector<1x2x128xf32>
      %91 = vector.shape_cast %90 : vector<1x2x128xf32> to vector<2x128xf32>
      %92 = vector.shape_cast %89 : vector<2x128xf32> to vector<1x2x128xf32>
      tpu.vector_store %arg4[%c0_42, %c0_43, %c0_44], %92 {strides = array<i32>} : memref<1x2x128xf32, #tpu.memory_space<vmem>>, vector<1x2x128xf32>,
    } else {
    }
    return
  }
  func.func @transform_0(%arg0: i32, %arg1: i32) -> (i32, i32) {
    %c1_i32 = arith.constant 1 : i32
    %0 = arith.muli %arg0, %c1_i32 : i32
    %1 = arith.addi %0, %arg1 : i32
    %c0_i32 = arith.constant 0 : i32
    %2 = arith.minsi %1, %c0_i32 : i32
    %c0_i32_0 = arith.constant 0 : i32
    %c0_i32_1 = arith.constant 0 : i32
    return %c0_i32_0, %2 : i32, i32
  }
  func.func @transform_1(%arg0: i32, %arg1: i32) -> (i32, i32) {
    %c1_i32 = arith.constant 1 : i32
    %0 = arith.muli %arg0, %c1_i32 : i32
    %1 = arith.addi %0, %arg1 : i32
    %c0_i32 = arith.constant 0 : i32
    %2 = arith.minsi %1, %c0_i32 : i32
    %c0_i32_0 = arith.constant 0 : i32
    %c0_i32_1 = arith.constant 0 : i32
    return %c0_i32_0, %2 : i32, i32
  }
  func.func @transform_2(%arg0: i32, %arg1: i32) -> (i32, i32, i32) {
    %c0_i32 = arith.constant 0 : i32
    %c0_i32_0 = arith.constant 0 : i32
    %c0_i32_1 = arith.constant 0 : i32
    return %arg0, %c0_i32, %c0_i32_0 : i32, i32, i32
  }
}

</mosaic_0001>

<bundles_post_ra>
// kernel: tpu_custom_call.1
= control target key start
LH: loop header
LB: loop body
LE: loop exit
PB: predicated region body
PF: predicated region fallthrough
CT: control target
= control target key end

     0   :  { %7 = vsyncpa [#allocation6], 0  ;;  %s368_s0 = inlined_call_operand.hbm [shape: f32[2,256], index: 0, kind: input, shape index: {}]   ;;  %s369_s1 = inlined_call_operand.hbm [shape: f32[2,256], index: 1, kind: input, shape index: {}]   ;;  %s370_s2 = inlined_call_operand.hbm [shape: f32[1,2,128], index: 2, kind: output, shape index: {}]  }
   0x1   :  { %8 = vsyncpa [#allocation9], 0 }
   0x2   :  { %9 = vsyncpa [#allocation7], 0  ;;  %s303_s9 = smov [#allocation5]   ;;  %s304_s11 = smov [#allocation8]  }
   0x3   :  { %s22_s10 = sshll.u32 %s303_s9, 4  ;;  %s38_s12 = sshll.u32 %s304_s11, 4  ;;  %s23_s10 = int_to_ptr.vmem [resolvable:$true] %s22_s10  ;;  %s39_s12 = int_to_ptr.vmem [resolvable:$true] %s38_s12 }
   0x4   :  { %s231_s15 = scalar_lea.hbm %s368_s0, 64 }
   0x5   :  { %p232_p0 = scmp.ne.s32.totalorder %s368_s0, %s231_s15  ;;  %p235_p1 = scmp.lt.u32.totalorder %s231_s15, %s368_s0 }
   0x7   :  { %p237_p2 = pnand %p235_p1, %p232_p0 }
   0x9   :  { %240 = shalt.err (!%p237_p2)
}
   0xa   :  { %s241_s20 = scalar_lea.vmem %s23_s10, 64  ;;  %p246_p4 = scmp.lt.s32.totalorder %s23_s10, %s23_s10 }
   0xb   :  { %p242_p3 = scmp.ne.s32.totalorder %s23_s10, %s241_s20  ;;  %p247_p5 = scmp.lt.s32.totalorder %s241_s20, %s241_s20 }
   0xd   :  { %p248_p6 = por %p247_p5, %p246_p4 }
   0xf   :  { %p249_p7 = pnand %p248_p6, %p242_p3 }
  0x11   :  { %252 = shalt.err (!%p249_p7)
}
  0x12   :  { %25 = dma.hbm_to_vmem [thread:$0]  %s368_s0, 64, %s23_s10, [#allocation6]  }
  0x13   :  { %s253_s25 = scalar_lea.hbm %s369_s1, 64 }
  0x14   :  { %p254_p8 = scmp.ne.s32.totalorder %s369_s1, %s253_s25  ;;  %p257_p9 = scmp.lt.u32.totalorder %s253_s25, %s369_s1 }
  0x16   :  { %p259_p10 = pnand %p257_p9, %p254_p8 }
  0x18   :  { %262 = shalt.err (!%p259_p10)
}
  0x19   :  { %s263_s30 = scalar_lea.vmem %s39_s12, 64  ;;  %p268_p12 = scmp.lt.s32.totalorder %s39_s12, %s39_s12 }
  0x1a   :  { %p264_p11 = scmp.ne.s32.totalorder %s39_s12, %s263_s30  ;;  %p269_p13 = scmp.lt.s32.totalorder %s263_s30, %s263_s30 }
  0x1c   :  { %p270_p0 = por %p269_p13, %p268_p12 }
  0x1e   :  { %p271_p1 = pnand %p270_p0, %p264_p11 }
  0x20   :  { %274 = shalt.err (!%p271_p1)
}
  0x21   :  { %41 = dma.hbm_to_vmem [thread:$0]  %s369_s1, 64, %s39_s12, [#allocation9]  }
  0x22   :  { %297 = dma.done.wait [#allocation6], 64  }
  0x23   :  { %298 = vsyncadd [#allocation6], 4294967232 }
  0x24   :  { %299 = dma.done.wait [#allocation9], 64  }
  0x25   :  { %300 = vsyncadd [#allocation9], 4294967232  ;;  %vm60_vm0 = vcmask 1024   ;;  %v305_v0 = vmov 0.0   ;;  %v64_v1 = vld [vmem:[#allocation5] sm:$0xf]  ;;  %v113_v12 = vlaneseq }
  0x26   :  { %63 = vst.msk [vmem:[#allocation4] sm:$0x3] %vm60_vm0, %v305_v0  ;;  %61 = vst.msk [vmem:[#allocation2] sm:$0x3] %vm60_vm0, %v305_v0  ;;  %v66_v2 = vand.u32 2147483647, %v64_v1 }
  0x27   :  { %62 = vst.msk [vmem:[#allocation3] sm:$0x3] %vm60_vm0, %v305_v0  ;;  %v65_v8 = vld [vmem:[#allocation8] sm:$0xf]  ;;  %v85_v11 = vsub.f32 0.0, %v64_v1  ;;  %vm73_vm1 = vcmp.ge.f32.partialorder %v64_v1, 0.0 }
  0x28   :  { %v67_v3 = vsub.f32 0.0, %v66_v2  ;;  %v306_v13 = vmov 1983009808   ;;  %v88_v15 = vmul.f32 5.0, %v65_v8  ;;  %v96_v16 = vmul.f32 4.0, %v65_v8  ;;  %s308_s1 = smov [#allocation10]  }
  0x29   :  { %v111_v14 = vunpack.c.l.s4 %v306_v13  ;;  %v86_v21 = vmax.f32 %v85_v11, 0.0  ;;  %v114_v22 = vshrl.u32 %v113_v12, 7  ;;  %v94_v24 = vsub.f32 1.0, %v65_v8  ;;  %s203_s4 = sshll.u32 %s308_s1, 4  ;;  %s204_s4 = int_to_ptr.vmem [resolvable:$true] %s203_s4 }
  0x2a   :  { %v68_v4 = vmul.f32 1.442695, %v67_v3  ;;  %v89_v26 = vadd.f32 1.0, %v88_v15  ;;  %v97_v28 = vadd.f32 1.0, %v96_v16  ;;  %v104_v29 = vmul.f32 0.5, %v65_v8  ;;  %s275_s5 = scalar_lea.vmem %s204_s4, 32  ;;  %p280_p3 = scmp.lt.s32.totalorder %s204_s4, %s204_s4 }
  0x2b   :  { %v112_v25 = vunpack.c.0.s8 %v111_v14  ;;  %v95_v35 = vmul.f32 %v94_v24, %v64_v1  ;;  %vm120_vm3 = vcmask 1041408   ;;  %v307_v62 = vmov 0   ;;  %p276_p2 = scmp.ne.s32.totalorder %s204_s4, %s275_s5  ;;  %p281_p4 = scmp.lt.s32.totalorder %s275_s5, %s275_s5 }
  0x2c   :  { %225 = vpow2.f32 %v68_v4  ;;  %v105_v41 = vadd.f32 0.25, %v104_v29  ;;  %223 = vset.pattern.permute.xlu1 %v307_v62  ;;  %224 = vset.pattern.permute.xlu0 %v307_v62  ;;  %v171_v11 = vand.u32 127, %v113_v12 }
  0x2d   :  { %v115_v37 = vsub.s32 %v112_v25, %v114_v22  ;;  %v108_v63 = vld [vmem:[#allocation2] sm:$0x3]  ;;  %v148_v2 = vld [vmem:[#allocation4] sm:$0x3]  ;;  %p282_p5 = por %p281_p4, %p280_p3 }
  0x2e   :  { %vm192_vm4 = vcmp.eq.s32.totalorder %v171_v11, 2  ;;  %vm191_vm5 = vcmp.eq.s32.totalorder %v171_v11, 1  ;;  %vm190_vm6 = vcmp.eq.s32.totalorder %v171_v11, 0 }
  0x2f   :  { %p283_p6 = pnand %p282_p5, %p276_p2 }
  0x36   :  { %v226_v5 = vpop.eup %225 }
  0x37   :  { %v70_v6 = vadd.f32 1.0, %v226_v5  ;;  %v79_v7 = vmul.f32 -0.5, %v226_v5  ;;  %v82_v10 = vand.u32 2147483647, %v226_v5 }
  0x39   :  { %227 = vrcp.f32 %v70_v6  ;;  %v80_v9 = vadd.f32 1.0, %v79_v7  ;;  %vm83_vm2 = vcmp.lt.f32.partialorder %v82_v10, 0.0004427343 }
  0x3a   :  { %229 = vlog2.f32 %v70_v6 }
  0x3b   :  { %v81_v18 = vmul.f32 %v226_v5, %v80_v9 }
  0x43   :  { %v228_v17 = vpop.eup %227 }
  0x44   :  { %v230_v19 = vpop.eup %229  ;;  %v74_v20 = vmul.f32 %v228_v17, %v226_v5  ;;  %v129_v5 = vld [vmem:[#allocation3] sm:$0x3] }
  0x45   :  { %v78_v23 = vmul.f32 0.6931472, %v230_v19 }
  0x46   :  { %v75_v27 = vsel %vm73_vm1, %v228_v17, %v74_v20 }
  0x47   :  { %v84_v30 = vsel %vm83_vm2, %v81_v18, %v78_v23  ;;  %v92_v31 = vadd.f32 %v75_v27, %v65_v8  ;;  %v100_v32 = vmul.f32 2.0, %v75_v27  ;;  %v90_v33 = vmul.f32 %v75_v27, %v65_v8 }
  0x48   :  { %v87_v34 = vadd.f32 %v86_v21, %v84_v30 }
  0x49   :  { %v101_v36 = vmul.f32 %v100_v32, %v65_v8  ;;  %v91_v38 = vmul.f32 %v90_v33, %v89_v26  ;;  %v93_v42 = vmul.f32 %v92_v31, %v89_v26 }
  0x4a   :  { %v98_v39 = vmul.f32 %v97_v28, %v87_v34 }
  0x4b   :  { %v102_v40 = vsub.f32 %v92_v31, %v101_v36  ;;  %v116_v43 = vrot.slane %v91_v38, %v115_v37  ;;  %v137_v49 = vrot.slane %v93_v42, %v115_v37 }
  0x4c   :  { %v99_v44 = vadd.f32 %v98_v39, %v95_v35 }
  0x4d   :  { %v103_v45 = vmul.f32 %v102_v40, %v102_v40  ;;  %v117_v46 = vcombine.high %v116_v43, %v116_v43  ;;  %v121_v47 = vsel %vm120_vm3, %v116_v43, 0.0  ;;  %v138_v54 = vcombine.high %v137_v49, %v137_v49 }
  0x4e   :  { %v141_v58 = vsel %vm120_vm3, %v137_v49, 0.0 }
  0x4f   :  { %v106_v48 = vmul.f32 %v105_v41, %v103_v45  ;;  %v122_v50 = vsel %vm120_vm3, %v117_v46, 0.0  ;;  %v142_v59 = vsel %vm120_vm3, %v138_v54, 0.0 }
  0x50   :  { %v123_v51 = vadd.f32 %v122_v50, %v121_v47  ;;  %v143_v61 = vadd.f32 %v142_v59, %v141_v58 }
  0x51   :  { %v107_v52 = vmul.f32 %v106_v48, %v99_v44 }
  0x52   :  { %124 = vadd.xlane.f32.xlu1 %v123_v51 }
  0x53   :  { %v156_v53 = vrot.slane %v107_v52, %v115_v37 }
  0x55   :  { %v157_v55 = vcombine.high %v156_v53, %v156_v53  ;;  %v160_v56 = vsel %vm120_vm3, %v156_v53, 0.0 }
  0x57   :  { %v161_v57 = vsel %vm120_vm3, %v157_v55, 0.0 }
  0x58   :  { %v162_v60 = vadd.f32 %v161_v57, %v160_v56 }
  0x5a   :  { %163 = vadd.xlane.f32.xlu0 %v162_v60 }
  0x5e   :  { %144 = vadd.xlane.f32.xlu0 %v143_v61 }
  0xdf   :  { %v125_v0 = vpop.xlane.xlu1 %124 }
  0xe0   :  { %v126_v1 = vadd.f32 %v125_v0, %v108_v63 }
  0xe2   :  { %128 = vst.msk [vmem:[#allocation2] sm:$0x3] %vm60_vm0, %v126_v1 }
  0xe7   :  { %v164_v3 = vpop.xlane.xlu0 %163 }
  0xe8   :  { %v165_v4 = vadd.f32 %v164_v3, %v148_v2 }
  0xe9   :  { %v172_v9 = vld [vmem:[#allocation2] sm:$0x3] }
  0xea   :  { %166 = vst.msk [vmem:[#allocation4] sm:$0x3] %vm60_vm0, %v165_v4 }
  0xeb   :  { %v145_v6 = vpop.xlane.xlu0 %144 }
  0xec   :  { %v146_v7 = vadd.f32 %v145_v6, %v129_v5 }
  0xee   :  { %147 = vst.msk [vmem:[#allocation3] sm:$0x3] %vm60_vm0, %v146_v7 }
  0xf1   :  { %v184_v8 = vld [vmem:[#allocation4] sm:$0x3] }
  0xf2   :  { %187 = vperm.xlu1 %223, %v184_v8  }
  0xf5   :  { %v178_v10 = vld [vmem:[#allocation3] sm:$0x3] }
  0xf6   :  { %181 = vperm.xlu0 %224, %v178_v10   ;;  %175 = vperm.xlu1 %223, %v172_v9  }
 0x171   :  { %v188_v13 = vpop.permute.xlu1 %187 }
 0x172   :  { %v193_v14 = vsel %vm192_vm4, %v188_v13, 0.0 }
 0x175   :  { %v182_v15 = vpop.permute.xlu0 %181  ;;  %v176_v16 = vpop.permute.xlu1 %175 }
 0x176   :  { %v194_v17 = vsel %vm191_vm5, %v182_v15, %v193_v14 }
 0x177   :  { %v195_v18 = vsel %vm190_vm6, %v176_v16, %v194_v17 }
 0x178   :  { %196 = vst [vmem:[#allocation10] sm:$0x3] %v195_v18 }
 0x179   :  { %286 = shalt.err (!%p283_p6)
}
 0x17a   :  { %s287_s8 = scalar_lea.hbm %s370_s2, 32 }
 0x17b   :  { %p288_p7 = scmp.ne.s32.totalorder %s370_s2, %s287_s8  ;;  %p291_p8 = scmp.lt.u32.totalorder %s287_s8, %s370_s2 }
 0x17d   :  { %p293_p9 = pnand %p291_p8, %p288_p7 }
 0x17f   :  { %296 = shalt.err (!%p293_p9)
}
 0x180   :  { %206 = dma.vmem_to_hbm [thread:$0]  %s204_s4, 32, %s370_s2, [#allocation7]  }
 0x181   :  { %301 = dma.done.wait [#allocation7], 32  }
 0x182   :  { %302 = vsyncadd [#allocation7], 4294967264 }
 0x183   :  { %210 = vsyncpa [#allocation6], 1 }
 0x184   :  { %211 = vsyncpa [#allocation9], 1 }
 0x185   :  { %212 = vsyncpa [#allocation7], 1 }

</bundles_post_ra>
